<compile_context>
chip_gen: v7x
topology: tpu7x:2x2x1
jax: 0.10.0
libtpu: 0.0.40
codegen_flags: <defaults>
</compile_context>

<pallas_src>
import functools

import jax
import jax.numpy as jnp
from jax import lax
from jax.experimental import pallas as pl
from jax.experimental.pallas import tpu as pltpu


def _mha_kernel(x_ref, wq_ref, wk_ref, wv_ref, bq_ref, bk_ref, bv_ref,
                wp_ref, bp_ref, o_ref, k_s, v_s, *, tq, num_heads, head_dim):
    q_idx = pl.program_id(1)

    # ---- K/V for all heads: full-width MXU matmuls, once per batch element ----
    @pl.when(q_idx == 0)
    def _():
        xall = x_ref[0]                                               # (N, C) bf16
        k_s[...] = (jnp.dot(xall, wk_ref[...],
                            preferred_element_type=jnp.float32)
                    + bk_ref[...]).astype(jnp.bfloat16)               # (N, C)
        v_s[...] = (jnp.dot(xall, wv_ref[...],
                            preferred_element_type=jnp.float32)
                    + bv_ref[...]).astype(jnp.bfloat16)               # (N, C)

    # ---- Q for this q-tile, all heads at once (full-width MXU) ----
    row0 = pl.multiple_of(q_idx * tq, tq)
    xq = x_ref[0, pl.ds(row0, tq), :]                                 # (tq, C) bf16
    qf = (jnp.dot(xq, wq_ref[...], preferred_element_type=jnp.float32)
          + bq_ref[...]).astype(jnp.bfloat16)                         # (tq, C); scale folded

    C_out = wp_ref.shape[1]
    acc = jnp.zeros((tq, C_out), dtype=jnp.float32)

    # ---- per-head attention; output projection folded into the head reduction ----
    for h in range(num_heads):
        sl = slice(h * head_dim, (h + 1) * head_dim)
        q_h = qf[:, sl]                                               # (tq, D) bf16
        k_h = k_s[:, sl]                                              # (N,  D) bf16
        v_h = v_s[:, sl]                                              # (N,  D) bf16

        # q @ k^T: contract last dims directly (standard flash pattern, no
        # materialized transpose of k).
        s = lax.dot_general(q_h, k_h, (((1,), (1,)), ((), ())),
                            preferred_element_type=jnp.float32)       # (tq, N) f32

        s = s - jnp.max(s, axis=-1, keepdims=True)
        p = jnp.exp(s)
        p = p * pl.reciprocal(jnp.sum(p, axis=-1, keepdims=True), approx=False)
        # dropout == identity (eval mode)

        o_h = jnp.dot(p.astype(jnp.bfloat16), v_h,
                      preferred_element_type=jnp.float32)             # (tq, D) f32

        acc = acc + jnp.dot(o_h.astype(jnp.bfloat16), wp_ref[sl, :],
                            preferred_element_type=jnp.float32)       # (tq, C) f32

    o_ref[0] = (acc + bp_ref[...]).astype(o_ref.dtype)


def _vmem_estimate_bytes(N, C, tq, out_itemsize):
    x_dbuf = 2 * N * C * 2                            # resident x block, double-buffered
    weights = 2 * (4 * C * C * 2 + 4 * C * 4)         # Wq/Wk/Wv/Wp bf16 + biases f32
    kv_cache = 2 * N * C * 2                          # K/V scratch, bf16
    out_dbuf = 2 * tq * C * out_itemsize
    transients = 3 * tq * N * 4 + 4 * tq * C * 4      # scores/p + q/acc working set
    return x_dbuf + weights + kv_cache + out_dbuf + transients


def _choose_q_tile(N, C, out_itemsize, budget_bytes=36 * 2**20):
    """Largest q-tile that keeps the VMEM working set under budget (v7x-safe)."""
    if N <= 256:
        return N
    candidates = [t for t in (1024, 512, 256, 128) if N % t == 0]
    for t in candidates:
        if _vmem_estimate_bytes(N, C, t, out_itemsize) <= budget_bytes:
            return t
    if candidates:
        return candidates[-1]   # best effort; the flash KV-axis TODO covers very long N
    return N


@functools.partial(jax.jit, static_argnames=("num_heads",))
def mha_forward(x, wqkv, bqkv, wproj, bproj, *, num_heads):
    """x: (B, N, C).  wqkv: (C, 3C), bqkv: (3C,), wproj: (C, C), bproj: (C,).

    Weights are in [in, out] layout (PyTorch nn.Linear weight transposed) so the
    kernel computes x @ W + b directly.
    """
    B, N, C = x.shape
    H = num_heads
    D = C // H
    scale = float(D) ** (-0.5)
    out_dtype = x.dtype
    out_itemsize = jnp.dtype(out_dtype).itemsize

    tq = _choose_q_tile(N, C, out_itemsize)
    nq = N // tq

    # --- weight prep (fused/const-folded under jit; precompute once for inference) ---
    x_bf = x.astype(jnp.bfloat16)
    wq = (wqkv[:, 0 * C:1 * C] * scale).astype(jnp.bfloat16)   # softmax scale folded in
    wk = wqkv[:, 1 * C:2 * C].astype(jnp.bfloat16)
    wv = wqkv[:, 2 * C:3 * C].astype(jnp.bfloat16)
    wp = wproj.astype(jnp.bfloat16)
    bq = (bqkv[0 * C:1 * C] * scale).reshape(1, C).astype(jnp.float32)
    bk = bqkv[1 * C:2 * C].reshape(1, C).astype(jnp.float32)
    bv = bqkv[2 * C:3 * C].reshape(1, C).astype(jnp.float32)
    bp = bproj.reshape(1, C).astype(jnp.float32)

    kernel = functools.partial(_mha_kernel, tq=tq, num_heads=H, head_dim=D)

    # advisory cost hint (K/V projected once per batch; weights streamed once)
    flops = int(8 * B * N * C * C + 4 * B * N * N * C)
    transcendentals = int(B * H * N * N)
    bytes_accessed = int(B * N * C * 2 + 4 * C * C * 2 + 4 * C * 4
                         + B * N * C * out_itemsize)

    est = _vmem_estimate_bytes(N, C, tq, out_itemsize)
    vmem_limit = int(min(48 * 2**20, max(32 * 2**20, int(1.5 * est))))

    return pl.pallas_call(
        kernel,
        out_shape=jax.ShapeDtypeStruct((B, N, C), out_dtype),
        grid_spec=pltpu.PrefetchScalarGridSpec(
            num_scalar_prefetch=0,
            grid=(B, nq),
            in_specs=[
                pl.BlockSpec((1, N, C), lambda b, q: (b, 0, 0)),   # x: resident per batch
                pl.BlockSpec((C, C), lambda b, q: (0, 0)),         # Wq (scale folded)
                pl.BlockSpec((C, C), lambda b, q: (0, 0)),         # Wk
                pl.BlockSpec((C, C), lambda b, q: (0, 0)),         # Wv
                pl.BlockSpec((1, C), lambda b, q: (0, 0)),         # bq (scale folded)
                pl.BlockSpec((1, C), lambda b, q: (0, 0)),         # bk
                pl.BlockSpec((1, C), lambda b, q: (0, 0)),         # bv
                pl.BlockSpec((C, C), lambda b, q: (0, 0)),         # Wproj
                pl.BlockSpec((1, C), lambda b, q: (0, 0)),         # bproj
            ],
            out_specs=pl.BlockSpec((1, tq, C), lambda b, q: (b, q, 0)),
            scratch_shapes=[pltpu.VMEM((N, C), jnp.bfloat16),      # K cache (all heads)
                            pltpu.VMEM((N, C), jnp.bfloat16)],     # V cache (all heads)
        ),
        compiler_params=pltpu.CompilerParams(
            # Batch elements are independent (megacore-shardable); q-tiles carry
            # the K/V cache so they must run sequentially.
            dimension_semantics=("parallel", "arbitrary"),
            vmem_limit_bytes=vmem_limit),
        cost_estimate=pl.CostEstimate(flops=flops,
                                      transcendentals=transcendentals,
                                      bytes_accessed=bytes_accessed),
    )(x_bf, wq, wk, wv, bq, bk, bv, wp, bp)


def mha_reference(x, wqkv, bqkv, wproj, bproj, *, num_heads):
    """Pure-JAX f32 reference mirroring the PyTorch forward (eval mode)."""
    B, N, C = x.shape
    D = C // num_heads
    scale = float(D) ** (-0.5)
    qkv = x @ wqkv + bqkv                                     # (B, N, 3C)
    qkv = qkv.reshape(B, N, 3, num_heads, D).transpose(2, 0, 3, 1, 4)
    q, k, v = qkv[0], qkv[1], qkv[2]                          # (B, H, N, D)
    attn = jnp.einsum("bhnd,bhmd->bhnm", q, k) * scale
    attn = jax.nn.softmax(attn, axis=-1)
    out = jnp.einsum("bhnm,bhmd->bhnd", attn, v)              # (B, H, N, D)
    out = out.transpose(0, 2, 1, 3).reshape(B, N, C)
    return out @ wproj + bproj


if __name__ == "__main__":
    B, N, C = 2, 8, 32
    num_heads = 4

    key = jax.random.PRNGKey(0)
    kx, kw1, kb1, kw2, kb2 = jax.random.split(key, 5)

    x = jax.random.normal(kx, (B, N, C), dtype=jnp.float32)
    # Deterministic parameter init (nn.Linear shapes, stored [in, out]).
    wqkv = jax.random.normal(kw1, (C, 3 * C), dtype=jnp.float32) * 0.05
    bqkv = jax.random.normal(kb1, (3 * C,), dtype=jnp.float32) * 0.05
    wproj = jax.random.normal(kw2, (C, C), dtype=jnp.float32) * 0.05
    bproj = jax.random.normal(kb2, (C,), dtype=jnp.float32) * 0.05

    out = mha_forward(x, wqkv, bqkv, wproj, bproj, num_heads=num_heads)
    out = jax.block_until_ready(out)

    ref = mha_reference(x, wqkv, bqkv, wproj, bproj, num_heads=num_heads)
    assert out.shape == (B, N, C)
    # bf16 MXU inputs -> slightly looser tolerance than a pure-f32 reference.
    assert jnp.allclose(out, ref, atol=2e-2, rtol=2e-2), "mismatch vs reference"

    print("KERNEL_OK")
</pallas_src>

<mosaic_0001>
module attributes {stable_mosaic.version = 11 : i64} {
  func.func @_mha_kernel(%arg0: i32, %arg1: i32, %arg2: memref<1x8x32xbf16, #tpu.memory_space<vmem>>, %arg3: memref<32x32xbf16, #tpu.memory_space<vmem>>, %arg4: memref<32x32xbf16, #tpu.memory_space<vmem>>, %arg5: memref<32x32xbf16, #tpu.memory_space<vmem>>, %arg6: memref<1x32xf32, #tpu.memory_space<vmem>>, %arg7: memref<1x32xf32, #tpu.memory_space<vmem>>, %arg8: memref<1x32xf32, #tpu.memory_space<vmem>>, %arg9: memref<32x32xbf16, #tpu.memory_space<vmem>>, %arg10: memref<1x32xf32, #tpu.memory_space<vmem>>, %arg11: memref<1x8x32xf32, #tpu.memory_space<vmem>>, %arg12: memref<8x32xbf16, #tpu.memory_space<vmem>>, %arg13: memref<8x32xbf16, #tpu.memory_space<vmem>>) attributes {dimension_semantics = [#tpu.dimension_semantics<parallel>, #tpu.dimension_semantics<arbitrary>], iteration_bounds = array<i64: 2, 1>, scalar_prefetch = 0 : i64, scratch_operands = 2 : i64, tpu.core_type = #tpu.core_type<tc>, window_params = [{transform_indices = @transform_0, window_bounds = array<i64: 1, 8, 32>}, {pipeline_mode = #tpu.pipeline_mode<synchronous>, transform_indices = @transform_1, window_bounds = array<i64: 32, 32>}, {pipeline_mode = #tpu.pipeline_mode<synchronous>, transform_indices = @transform_2, window_bounds = array<i64: 32, 32>}, {pipeline_mode = #tpu.pipeline_mode<synchronous>, transform_indices = @transform_3, window_bounds = array<i64: 32, 32>}, {pipeline_mode = #tpu.pipeline_mode<synchronous>, transform_indices = @transform_4, window_bounds = array<i64: 1, 32>}, {pipeline_mode = #tpu.pipeline_mode<synchronous>, transform_indices = @transform_5, window_bounds = array<i64: 1, 32>}, {pipeline_mode = #tpu.pipeline_mode<synchronous>, transform_indices = @transform_6, window_bounds = array<i64: 1, 32>}, {pipeline_mode = #tpu.pipeline_mode<synchronous>, transform_indices = @transform_7, window_bounds = array<i64: 32, 32>}, {pipeline_mode = #tpu.pipeline_mode<synchronous>, transform_indices = @transform_8, window_bounds = array<i64: 1, 32>}, {transform_indices = @transform_9, window_bounds = array<i64: 1, 8, 32>}]} {
    %c0_i32 = arith.constant 0 : i32
    %0 = arith.cmpi eq, %arg1, %c0_i32 : i32
    %1 = arith.extui %0 : i1 to i32
    %c0_i32_0 = arith.constant 0 : i32
    %2 = arith.cmpi ne, %1, %c0_i32_0 : i32
    scf.if %2 {
      %c0_53 = arith.constant 0 : index
      %c0_54 = arith.constant 0 : index
      %c0_55 = arith.constant 0 : index
      %101 = vector.load %arg2[%c0_53, %c0_54, %c0_55] : memref<1x8x32xbf16, #tpu.memory_space<vmem>>, vector<1x8x32xbf16>
      %102 = vector.shape_cast %101 : vector<1x8x32xbf16> to vector<8x32xbf16>
      %c0_56 = arith.constant 0 : index
      %c0_57 = arith.constant 0 : index
      %103 = vector.load %arg4[%c0_56, %c0_57] : memref<32x32xbf16, #tpu.memory_space<vmem>>, vector<32x32xbf16>
      %cst_58 = arith.constant dense<0.000000e+00> : vector<8x32xf32>
      %104 = tpu.matmul %102, %103, %cst_58 {dimension_numbers = #tpu.dot_dimension_numbers<[1], [0], [0], [1], [0, 0, 1, 1], [], []>} : vector<8x32xbf16>, vector<32x32xbf16>, vector<8x32xf32> -> vector<8x32xf32>
      %c0_59 = arith.constant 0 : index
      %c0_60 = arith.constant 0 : index
      %105 = vector.load %arg7[%c0_59, %c0_60] : memref<1x32xf32, #tpu.memory_space<vmem>>, vector<1x32xf32>
      %106 = vector.broadcast %105 : vector<1x32xf32> to vector<8x32xf32>
      %107 = arith.addf %104, %106 : vector<8x32xf32>
      %108 = arith.truncf %107 : vector<8x32xf32> to vector<8x32xbf16>
      %c0_61 = arith.constant 0 : index
      %c0_62 = arith.constant 0 : index
      %109 = vector.load %arg12[%c0_61, %c0_62] : memref<8x32xbf16, #tpu.memory_space<vmem>>, vector<8x32xbf16>
      tpu.vector_store %arg12[%c0_61, %c0_62], %108 {strides = array<i32>} : memref<8x32xbf16, #tpu.memory_space<vmem>>, vector<8x32xbf16>,
      %c0_63 = arith.constant 0 : index
      %c0_64 = arith.constant 0 : index
      %110 = vector.load %arg5[%c0_63, %c0_64] : memref<32x32xbf16, #tpu.memory_space<vmem>>, vector<32x32xbf16>
      %cst_65 = arith.constant dense<0.000000e+00> : vector<8x32xf32>
      %111 = tpu.matmul %102, %110, %cst_65 {dimension_numbers = #tpu.dot_dimension_numbers<[1], [0], [0], [1], [0, 0, 1, 1], [], []>} : vector<8x32xbf16>, vector<32x32xbf16>, vector<8x32xf32> -> vector<8x32xf32>
      %c0_66 = arith.constant 0 : index
      %c0_67 = arith.constant 0 : index
      %112 = vector.load %arg8[%c0_66, %c0_67] : memref<1x32xf32, #tpu.memory_space<vmem>>, vector<1x32xf32>
      %113 = vector.broadcast %112 : vector<1x32xf32> to vector<8x32xf32>
      %114 = arith.addf %111, %113 : vector<8x32xf32>
      %115 = arith.truncf %114 : vector<8x32xf32> to vector<8x32xbf16>
      %c0_68 = arith.constant 0 : index
      %c0_69 = arith.constant 0 : index
      %116 = vector.load %arg13[%c0_68, %c0_69] : memref<8x32xbf16, #tpu.memory_space<vmem>>, vector<8x32xbf16>
      tpu.vector_store %arg13[%c0_68, %c0_69], %115 {strides = array<i32>} : memref<8x32xbf16, #tpu.memory_space<vmem>>, vector<8x32xbf16>,
    } else {
    }
    %c8_i32 = arith.constant 8 : i32
    %3 = arith.muli %arg1, %c8_i32 : i32
    %4 = tpu.assume_multiple %3, 8 : i32
    %c0 = arith.constant 0 : index
    %5 = arith.index_cast %4 : i32 to index
    %c0_1 = arith.constant 0 : index
    %6 = vector.load %arg2[%c0, %5, %c0_1] : memref<1x8x32xbf16, #tpu.memory_space<vmem>>, vector<1x8x32xbf16>
    %7 = vector.shape_cast %6 : vector<1x8x32xbf16> to vector<8x32xbf16>
    %c0_2 = arith.constant 0 : index
    %c0_3 = arith.constant 0 : index
    %8 = vector.load %arg3[%c0_2, %c0_3] : memref<32x32xbf16, #tpu.memory_space<vmem>>, vector<32x32xbf16>
    %cst = arith.constant dense<0.000000e+00> : vector<8x32xf32>
    %9 = tpu.matmul %7, %8, %cst {dimension_numbers = #tpu.dot_dimension_numbers<[1], [0], [0], [1], [0, 0, 1, 1], [], []>} : vector<8x32xbf16>, vector<32x32xbf16>, vector<8x32xf32> -> vector<8x32xf32>
    %c0_4 = arith.constant 0 : index
    %c0_5 = arith.constant 0 : index
    %10 = vector.load %arg6[%c0_4, %c0_5] : memref<1x32xf32, #tpu.memory_space<vmem>>, vector<1x32xf32>
    %11 = vector.broadcast %10 : vector<1x32xf32> to vector<8x32xf32>
    %12 = arith.addf %9, %11 : vector<8x32xf32>
    %13 = arith.truncf %12 : vector<8x32xf32> to vector<8x32xbf16>
    %cst_6 = arith.constant 0.000000e+00 : f32
    %14 = vector.broadcast %cst_6 : f32 to vector<8x32xf32>
    %15 = vector.extract_strided_slice %13 {offsets = [0, 0], sizes = [8, 8], strides = [1, 1]} : vector<8x32xbf16> to vector<8x8xbf16>
    %c0_7 = arith.constant 0 : index
    %c0_8 = arith.constant 0 : index
    %16 = vector.load %arg12[%c0_7, %c0_8] : memref<8x32xbf16, #tpu.memory_space<vmem>>, vector<8x8xbf16>
    %c0_9 = arith.constant 0 : index
    %c0_10 = arith.constant 0 : index
    %17 = vector.load %arg13[%c0_9, %c0_10] : memref<8x32xbf16, #tpu.memory_space<vmem>>, vector<8x8xbf16>
    %cst_11 = arith.constant dense<0.000000e+00> : vector<8x8xf32>
    %18 = tpu.matmul %15, %16, %cst_11 {dimension_numbers = #tpu.dot_dimension_numbers<[1], [1], [0], [0], [0, 0, 1, 0], [], []>} : vector<8x8xbf16>, vector<8x8xbf16>, vector<8x8xf32> -> vector<8x8xf32>
    %cst_12 = arith.constant dense<0xFF800000> : vector<8xf32>
    %19 = vector.multi_reduction <maximumf>, %18, %cst_12 [1] : vector<8x8xf32> to vector<8xf32>
    %20 = vector.shape_cast %19 : vector<8xf32> to vector<8x1xf32>
    %21 = vector.broadcast %20 : vector<8x1xf32> to vector<8x8xf32>
    %22 = arith.subf %18, %21 : vector<8x8xf32>
    %23 = math.exp %22 : vector<8x8xf32>
    %cst_13 = arith.constant dense<0.000000e+00> : vector<8xf32>
    %24 = vector.multi_reduction <add>, %23, %cst_13 [1] : vector<8x8xf32> to vector<8xf32>
    %25 = vector.shape_cast %24 : vector<8xf32> to vector<8x1xf32>
    %26 = tpu.reciprocal %25 : vector<8x1xf32> -> vector<8x1xf32>
    %27 = vector.broadcast %26 : vector<8x1xf32> to vector<8x8xf32>
    %28 = arith.mulf %23, %27 : vector<8x8xf32>
    %29 = arith.truncf %28 : vector<8x8xf32> to vector<8x8xbf16>
    %cst_14 = arith.constant dense<0.000000e+00> : vector<8x8xf32>
    %30 = tpu.matmul %29, %17, %cst_14 {dimension_numbers = #tpu.dot_dimension_numbers<[1], [0], [0], [1], [0, 0, 1, 1], [], []>} : vector<8x8xbf16>, vector<8x8xbf16>, vector<8x8xf32> -> vector<8x8xf32>
    %31 = arith.truncf %30 : vector<8x8xf32> to vector<8x8xbf16>
    %c0_15 = arith.constant 0 : index
    %c0_16 = arith.constant 0 : index
    %32 = vector.load %arg9[%c0_15, %c0_16] : memref<32x32xbf16, #tpu.memory_space<vmem>>, vector<8x32xbf16>
    %cst_17 = arith.constant dense<0.000000e+00> : vector<8x32xf32>
    %33 = tpu.matmul %31, %32, %cst_17 {dimension_numbers = #tpu.dot_dimension_numbers<[1], [0], [0], [1], [0, 0, 1, 1], [], []>} : vector<8x8xbf16>, vector<8x32xbf16>, vector<8x32xf32> -> vector<8x32xf32>
    %34 = arith.addf %14, %33 : vector<8x32xf32>
    %35 = vector.extract_strided_slice %13 {offsets = [0, 8], sizes = [8, 8], strides = [1, 1]} : vector<8x32xbf16> to vector<8x8xbf16>
    %c0_18 = arith.constant 0 : index
    %c8 = arith.constant 8 : index
    %36 = vector.load %arg12[%c0_18, %c8] : memref<8x32xbf16, #tpu.memory_space<vmem>>, vector<8x8xbf16>
    %c0_19 = arith.constant 0 : index
    %c8_20 = arith.constant 8 : index
    %37 = vector.load %arg13[%c0_19, %c8_20] : memref<8x32xbf16, #tpu.memory_space<vmem>>, vector<8x8xbf16>
    %cst_21 = arith.constant dense<0.000000e+00> : vector<8x8xf32>
    %38 = tpu.matmul %35, %36, %cst_21 {dimension_numbers = #tpu.dot_dimension_numbers<[1], [1], [0], [0], [0, 0, 1, 0], [], []>} : vector<8x8xbf16>, vector<8x8xbf16>, vector<8x8xf32> -> vector<8x8xf32>
    %cst_22 = arith.constant dense<0xFF800000> : vector<8xf32>
    %39 = vector.multi_reduction <maximumf>, %38, %cst_22 [1] : vector<8x8xf32> to vector<8xf32>
    %40 = vector.shape_cast %39 : vector<8xf32> to vector<8x1xf32>
    %41 = vector.broadcast %40 : vector<8x1xf32> to vector<8x8xf32>
    %42 = arith.subf %38, %41 : vector<8x8xf32>
    %43 = math.exp %42 : vector<8x8xf32>
    %cst_23 = arith.constant dense<0.000000e+00> : vector<8xf32>
    %44 = vector.multi_reduction <add>, %43, %cst_23 [1] : vector<8x8xf32> to vector<8xf32>
    %45 = vector.shape_cast %44 : vector<8xf32> to vector<8x1xf32>
    %46 = tpu.reciprocal %45 : vector<8x1xf32> -> vector<8x1xf32>
    %47 = vector.broadcast %46 : vector<8x1xf32> to vector<8x8xf32>
    %48 = arith.mulf %43, %47 : vector<8x8xf32>
    %49 = arith.truncf %48 : vector<8x8xf32> to vector<8x8xbf16>
    %cst_24 = arith.constant dense<0.000000e+00> : vector<8x8xf32>
    %50 = tpu.matmul %49, %37, %cst_24 {dimension_numbers = #tpu.dot_dimension_numbers<[1], [0], [0], [1], [0, 0, 1, 1], [], []>} : vector<8x8xbf16>, vector<8x8xbf16>, vector<8x8xf32> -> vector<8x8xf32>
    %51 = arith.truncf %50 : vector<8x8xf32> to vector<8x8xbf16>
    %c8_25 = arith.constant 8 : index
    %c0_26 = arith.constant 0 : index
    %52 = vector.load %arg9[%c8_25, %c0_26] : memref<32x32xbf16, #tpu.memory_space<vmem>>, vector<8x32xbf16>
    %cst_27 = arith.constant dense<0.000000e+00> : vector<8x32xf32>
    %53 = tpu.matmul %51, %52, %cst_27 {dimension_numbers = #tpu.dot_dimension_numbers<[1], [0], [0], [1], [0, 0, 1, 1], [], []>} : vector<8x8xbf16>, vector<8x32xbf16>, vector<8x32xf32> -> vector<8x32xf32>
    %54 = arith.addf %34, %53 : vector<8x32xf32>
    %55 = vector.extract_strided_slice %13 {offsets = [0, 16], sizes = [8, 8], strides = [1, 1]} : vector<8x32xbf16> to vector<8x8xbf16>
    %c0_28 = arith.constant 0 : index
    %c16 = arith.constant 16 : index
    %56 = vector.load %arg12[%c0_28, %c16] : memref<8x32xbf16, #tpu.memory_space<vmem>>, vector<8x8xbf16>
    %c0_29 = arith.constant 0 : index
    %c16_30 = arith.constant 16 : index
    %57 = vector.load %arg13[%c0_29, %c16_30] : memref<8x32xbf16, #tpu.memory_space<vmem>>, vector<8x8xbf16>
    %cst_31 = arith.constant dense<0.000000e+00> : vector<8x8xf32>
    %58 = tpu.matmul %55, %56, %cst_31 {dimension_numbers = #tpu.dot_dimension_numbers<[1], [1], [0], [0], [0, 0, 1, 0], [], []>} : vector<8x8xbf16>, vector<8x8xbf16>, vector<8x8xf32> -> vector<8x8xf32>
    %cst_32 = arith.constant dense<0xFF800000> : vector<8xf32>
    %59 = vector.multi_reduction <maximumf>, %58, %cst_32 [1] : vector<8x8xf32> to vector<8xf32>
    %60 = vector.shape_cast %59 : vector<8xf32> to vector<8x1xf32>
    %61 = vector.broadcast %60 : vector<8x1xf32> to vector<8x8xf32>
    %62 = arith.subf %58, %61 : vector<8x8xf32>
    %63 = math.exp %62 : vector<8x8xf32>
    %cst_33 = arith.constant dense<0.000000e+00> : vector<8xf32>
    %64 = vector.multi_reduction <add>, %63, %cst_33 [1] : vector<8x8xf32> to vector<8xf32>
    %65 = vector.shape_cast %64 : vector<8xf32> to vector<8x1xf32>
    %66 = tpu.reciprocal %65 : vector<8x1xf32> -> vector<8x1xf32>
    %67 = vector.broadcast %66 : vector<8x1xf32> to vector<8x8xf32>
    %68 = arith.mulf %63, %67 : vector<8x8xf32>
    %69 = arith.truncf %68 : vector<8x8xf32> to vector<8x8xbf16>
    %cst_34 = arith.constant dense<0.000000e+00> : vector<8x8xf32>
    %70 = tpu.matmul %69, %57, %cst_34 {dimension_numbers = #tpu.dot_dimension_numbers<[1], [0], [0], [1], [0, 0, 1, 1], [], []>} : vector<8x8xbf16>, vector<8x8xbf16>, vector<8x8xf32> -> vector<8x8xf32>
    %71 = arith.truncf %70 : vector<8x8xf32> to vector<8x8xbf16>
    %c16_35 = arith.constant 16 : index
    %c0_36 = arith.constant 0 : index
    %72 = vector.load %arg9[%c16_35, %c0_36] : memref<32x32xbf16, #tpu.memory_space<vmem>>, vector<8x32xbf16>
    %cst_37 = arith.constant dense<0.000000e+00> : vector<8x32xf32>
    %73 = tpu.matmul %71, %72, %cst_37 {dimension_numbers = #tpu.dot_dimension_numbers<[1], [0], [0], [1], [0, 0, 1, 1], [], []>} : vector<8x8xbf16>, vector<8x32xbf16>, vector<8x32xf32> -> vector<8x32xf32>
    %74 = arith.addf %54, %73 : vector<8x32xf32>
    %75 = vector.extract_strided_slice %13 {offsets = [0, 24], sizes = [8, 8], strides = [1, 1]} : vector<8x32xbf16> to vector<8x8xbf16>
    %c0_38 = arith.constant 0 : index
    %c24 = arith.constant 24 : index
    %76 = vector.load %arg12[%c0_38, %c24] : memref<8x32xbf16, #tpu.memory_space<vmem>>, vector<8x8xbf16>
    %c0_39 = arith.constant 0 : index
    %c24_40 = arith.constant 24 : index
    %77 = vector.load %arg13[%c0_39, %c24_40] : memref<8x32xbf16, #tpu.memory_space<vmem>>, vector<8x8xbf16>
    %cst_41 = arith.constant dense<0.000000e+00> : vector<8x8xf32>
    %78 = tpu.matmul %75, %76, %cst_41 {dimension_numbers = #tpu.dot_dimension_numbers<[1], [1], [0], [0], [0, 0, 1, 0], [], []>} : vector<8x8xbf16>, vector<8x8xbf16>, vector<8x8xf32> -> vector<8x8xf32>
    %cst_42 = arith.constant dense<0xFF800000> : vector<8xf32>
    %79 = vector.multi_reduction <maximumf>, %78, %cst_42 [1] : vector<8x8xf32> to vector<8xf32>
    %80 = vector.shape_cast %79 : vector<8xf32> to vector<8x1xf32>
    %81 = vector.broadcast %80 : vector<8x1xf32> to vector<8x8xf32>
    %82 = arith.subf %78, %81 : vector<8x8xf32>
    %83 = math.exp %82 : vector<8x8xf32>
    %cst_43 = arith.constant dense<0.000000e+00> : vector<8xf32>
    %84 = vector.multi_reduction <add>, %83, %cst_43 [1] : vector<8x8xf32> to vector<8xf32>
    %85 = vector.shape_cast %84 : vector<8xf32> to vector<8x1xf32>
    %86 = tpu.reciprocal %85 : vector<8x1xf32> -> vector<8x1xf32>
    %87 = vector.broadcast %86 : vector<8x1xf32> to vector<8x8xf32>
    %88 = arith.mulf %83, %87 : vector<8x8xf32>
    %89 = arith.truncf %88 : vector<8x8xf32> to vector<8x8xbf16>
    %cst_44 = arith.constant dense<0.000000e+00> : vector<8x8xf32>
    %90 = tpu.matmul %89, %77, %cst_44 {dimension_numbers = #tpu.dot_dimension_numbers<[1], [0], [0], [1], [0, 0, 1, 1], [], []>} : vector<8x8xbf16>, vector<8x8xbf16>, vector<8x8xf32> -> vector<8x8xf32>
    %91 = arith.truncf %90 : vector<8x8xf32> to vector<8x8xbf16>
    %c24_45 = arith.constant 24 : index
    %c0_46 = arith.constant 0 : index
    %92 = vector.load %arg9[%c24_45, %c0_46] : memref<32x32xbf16, #tpu.memory_space<vmem>>, vector<8x32xbf16>
    %cst_47 = arith.constant dense<0.000000e+00> : vector<8x32xf32>
    %93 = tpu.matmul %91, %92, %cst_47 {dimension_numbers = #tpu.dot_dimension_numbers<[1], [0], [0], [1], [0, 0, 1, 1], [], []>} : vector<8x8xbf16>, vector<8x32xbf16>, vector<8x32xf32> -> vector<8x32xf32>
    %94 = arith.addf %74, %93 : vector<8x32xf32>
    %c0_48 = arith.constant 0 : index
    %c0_49 = arith.constant 0 : index
    %95 = vector.load %arg10[%c0_48, %c0_49] : memref<1x32xf32, #tpu.memory_space<vmem>>, vector<1x32xf32>
    %96 = vector.broadcast %95 : vector<1x32xf32> to vector<8x32xf32>
    %97 = arith.addf %94, %96 : vector<8x32xf32>
    %c0_50 = arith.constant 0 : index
    %c0_51 = arith.constant 0 : index
    %c0_52 = arith.constant 0 : index
    %98 = vector.load %arg11[%c0_50, %c0_51, %c0_52] : memref<1x8x32xf32, #tpu.memory_space<vmem>>, vector<1x8x32xf32>
    %99 = vector.shape_cast %98 : vector<1x8x32xf32> to vector<8x32xf32>
    %100 = vector.shape_cast %97 : vector<8x32xf32> to vector<1x8x32xf32>
    tpu.vector_store %arg11[%c0_50, %c0_51, %c0_52], %100 {strides = array<i32>} : memref<1x8x32xf32, #tpu.memory_space<vmem>>, vector<1x8x32xf32>,
    return
  }
  func.func @transform_0(%arg0: i32, %arg1: i32) -> (i32, i32, i32) {
    %c0_i32 = arith.constant 0 : i32
    %c0_i32_0 = arith.constant 0 : i32
    %c0_i32_1 = arith.constant 0 : i32
    return %arg0, %c0_i32, %c0_i32_0 : i32, i32, i32
  }
  func.func @transform_1(%arg0: i32, %arg1: i32) -> (i32, i32) {
    %c0_i32 = arith.constant 0 : i32
    %c0_i32_0 = arith.constant 0 : i32
    %c0_i32_1 = arith.constant 0 : i32
    return %c0_i32, %c0_i32_0 : i32, i32
  }
  func.func @transform_2(%arg0: i32, %arg1: i32) -> (i32, i32) {
    %c0_i32 = arith.constant 0 : i32
    %c0_i32_0 = arith.constant 0 : i32
    %c0_i32_1 = arith.constant 0 : i32
    return %c0_i32, %c0_i32_0 : i32, i32
  }
  func.func @transform_3(%arg0: i32, %arg1: i32) -> (i32, i32) {
    %c0_i32 = arith.constant 0 : i32
    %c0_i32_0 = arith.constant 0 : i32
    %c0_i32_1 = arith.constant 0 : i32
    return %c0_i32, %c0_i32_0 : i32, i32
  }
  func.func @transform_4(%arg0: i32, %arg1: i32) -> (i32, i32) {
    %c0_i32 = arith.constant 0 : i32
    %c0_i32_0 = arith.constant 0 : i32
    %c0_i32_1 = arith.constant 0 : i32
    return %c0_i32, %c0_i32_0 : i32, i32
  }
  func.func @transform_5(%arg0: i32, %arg1: i32) -> (i32, i32) {
    %c0_i32 = arith.constant 0 : i32
    %c0_i32_0 = arith.constant 0 : i32
    %c0_i32_1 = arith.constant 0 : i32
    return %c0_i32, %c0_i32_0 : i32, i32
  }
  func.func @transform_6(%arg0: i32, %arg1: i32) -> (i32, i32) {
    %c0_i32 = arith.constant 0 : i32
    %c0_i32_0 = arith.constant 0 : i32
    %c0_i32_1 = arith.constant 0 : i32
    return %c0_i32, %c0_i32_0 : i32, i32
  }
  func.func @transform_7(%arg0: i32, %arg1: i32) -> (i32, i32) {
    %c0_i32 = arith.constant 0 : i32
    %c0_i32_0 = arith.constant 0 : i32
    %c0_i32_1 = arith.constant 0 : i32
    return %c0_i32, %c0_i32_0 : i32, i32
  }
  func.func @transform_8(%arg0: i32, %arg1: i32) -> (i32, i32) {
    %c0_i32 = arith.constant 0 : i32
    %c0_i32_0 = arith.constant 0 : i32
    %c0_i32_1 = arith.constant 0 : i32
    return %c0_i32, %c0_i32_0 : i32, i32
  }
  func.func @transform_9(%arg0: i32, %arg1: i32) -> (i32, i32, i32) {
    %c0_i32 = arith.constant 0 : i32
    %c0_i32_0 = arith.constant 0 : i32
    return %arg0, %arg1, %c0_i32 : i32, i32, i32
  }
}

</mosaic_0001>

<bundles_post_ra>
// kernel: mha_forward.1
= control target key start
LH: loop header
LB: loop body
LE: loop exit
PB: predicated region body
PF: predicated region fallthrough
CT: control target
= control target key end

     0   :  { %14 = vsyncpa [#allocation5], 0  ;;  %s1942_s0 = inlined_call_operand.vmem [shape: bf16[2,8,32], index: 0, kind: input, shape index: {}]   ;;  %s1943_s1 = inlined_call_operand.vmem [shape: bf16[32,32], index: 1, kind: input, shape index: {}]   ;;  %s1944_s2 = inlined_call_operand.vmem [shape: bf16[32,32], index: 2, kind: input, shape index: {}]   ;;  %s1945_s3 = inlined_call_operand.vmem [shape: bf16[32,32], index: 3, kind: input, shape index: {}]   ;;  %s1946_s4 = inlined_call_operand.vmem [shape: f32[1,32], index: 4, kind: input, shape index: {}]   ;;  %s1947_s5 = inlined_call_operand.vmem [shape: f32[1,32], index: 5, kind: input, shape index: {}]   ;;  %s1948_s6 = inlined_call_operand.vmem [shape: f32[1,32], index: 6, kind: input, shape index: {}]   ;;  %s1949_s7 = inlined_call_operand.vmem [shape: bf16[32,32], index: 7, kind: input, shape index: {}]   ;;  %s1950_s8 = inlined_call_operand.vmem [shape: f32[1,32], index: 8, kind: input, shape index: {}]   ;;  %s1951_s9 = inlined_call_operand.hbm [shape: f32[2,8,32], index: 9, kind: output, shape index: {}]  }
   0x1   :  { %16 = vsyncpa [#allocation5 + $0x1], 0  ;;  %s1677_s30 = smov 0   ;;  %s1679_s10 = smov 0  }
   0x2   :  { %s1681_s11 = smov 0   ;;  %s1683_s12 = smov 0  }
   0x3   :  { %s1685_s13 = smov 0   ;;  %s1687_s14 = smov 0  }
   0x4 LB: > { %s1290_s15 = sadd.s32 4294967295, %s1619_s14   ;;  %s1291_s16 = sadd.s32 4294967294, %s1619_s14   ;;  %s1619_s14 = sphi %s1687_s14, %s22_s14   ;;  %s1615_s13 = sphi %s1685_s13, %s1958_s13   ;;  %s1611_s12 = sphi %s1683_s12, %s1957_s12   ;;  %s1607_s11 = sphi %s1681_s11, %s1956_s11   ;;  %s1603_s10 = sphi %s1679_s10, %s1955_s10   ;;  %s1599_s30 = sphi %s1677_s30, %s1954_s30  }
   0x5   : > { %s34_s17 = sadd.s32 1, %s1615_s13  ;;  %s237_s18 = sadd.s32 1, %s1607_s11 }
   0x6   : > { %p36_p0 = scmp.ge.s32.totalorder %s34_s17, 2  ;;  %p247_p1 = scmp.ne.s32.totalorder %s1607_s11, %s1603_s10 }
   0x7   : > { %p248_p2 = scmp.eq.s32.totalorder %s1290_s15, 1  ;;  %p253_p3 = scmp.ne.s32.totalorder %s1603_s10, %s1599_s30 }
   0x8   : > { %s1960_s17 = smov (%p36_p0, %s34_s17), 0  ;;  %p254_p5 = scmp.eq.s32.totalorder %s1291_s16, 1 }
   0x9   : > { %p1717_p4 = por %p248_p2, %p247_p1  ;;  %s232_s20 = ssub.s32 %s1615_s13, %s1960_s17 }
   0xa   : > { %p1294_p6 = scmp.ge.s32.totalorder %s1619_s14, 1  ;;  %p235_p7 = scmp.eq.s32.totalorder %s232_s20, 0 }
   0xb   : > { %p1724_p8 = por %p254_p5, %p253_p3  ;;  %p303_p9 = scmp.lt.s32.totalorder %s1619_s14, 3 }
   0xc   : > { %s1730_s22 = scalar_select %p235_p7, %s1607_s11, %s237_s18  }
   0xd   : > { %p304_p10 = pnand %p1294_p6, %p303_p9 }
   0xe   : > { %v1517_v0 = vld [vmem:[%s1944_s2] sm:$0xff] (!%p304_p10)   ;;  %v1621_v1 = vmov (!%p304_p10), 0.0   ;;  %v1518_v2 = vld [vmem:[%s1944_s2 + $0x8] sm:$0xff] (!%p304_p10)   ;;  %vm1622_vm0 = vmmov (!%p304_p10), 0   ;;  %p338_p11 = scmp.lt.s32.totalorder (!%p304_p10), %s1611_s12, 1  ;;  %vm371_vm1 = vcmask (!%p304_p10), 261120  }
   0xf   : > { %307 = sbr.rel (%p304_p10) target bundleno = 2634 (0xa4a), region = 56  ;;  %1361 = vmatprep.subr.bf16.mxu0 (!%p304_p10), %v1621_v1  ;;  %1369 = vmatprep.subr.bf16.mxu1 (!%p304_p10), %v1621_v1  ;;  %v1519_v3 = vld [vmem:[%s1943_s1] sm:$0xff] (!%p304_p10)   ;;  %v1520_v5 = vld [vmem:[%s1943_s1 + $0x8] sm:$0xff] (!%p304_p10)   ;;  %vm416_vm2 = vcmask (!%p304_p10), 257024   ;;  %vm559_vm3 = vcmask (!%p304_p10), 64512   ;;  %vm621_vm4 = vcmask (!%p304_p10), 1043456  }
  0x10   : > { %1362 = vmatpush3.bf16.msra.mxu0 (!%p304_p10), %v1517_v0  ;;  %1365 = vmatprep.mubr.msk.bf16.mxu0 (!%p304_p10), %vm1622_vm0, %v1621_v1  ;;  %v1521_v7 = vld [vmem:[%s1945_s3] sm:$0xff] (!%p304_p10)   ;;  %v1522_v8 = vld [vmem:[%s1945_s3 + $0x8] sm:$0xff] (!%p304_p10)   ;;  %s1624_s25 = smov (!%p304_p10), 112   ;;  %s1625_s15 = smov (!%p304_p10), 104  }
  0x11   : > { %1363 = vmatprep.subr.bf16.mxu0 (!%p304_p10), %v1621_v1  ;;  %1373 = vmatprep.mubr.msk.bf16.mxu1 (!%p304_p10), %vm1622_vm0, %v1621_v1  ;;  %v1297_v9 = vld [vmem:[%s1947_s5] ss:$0 sm:$0xff] (!%p304_p10)  ;;  %v785_v63 = vld [vmem:[%s1949_s7 + $0x4] sm:$0xf] (!%p304_p10)  ;;  %s335_s24 = sand.u32 (!%p304_p10), 1, %s1603_s10  }
  0x12   : > { %1370 = vmatpush3.bf16.msra.mxu1 (!%p304_p10), %v1521_v7  ;;  %v1305_v18 = vld [vmem:[%s1946_s4] ss:$0 sm:$0xff] (!%p304_p10)  ;;  %v790_v0 = vsel (!%p304_p10), %vm621_vm4, %v785_v63, 0 }
  0x13   : > { %1371 = vmatprep.subr.bf16.mxu1 (!%p304_p10), %v1621_v1  ;;  %v1301_v26 = vld [vmem:[%s1948_s6] ss:$0 sm:$0xff] (!%p304_p10) }
  0x14   : > { %1364 = vmatpush3.bf16.msra.mxu0 (!%p304_p10), %v1518_v2 }
  0x15   : > { %1377 = vmatprep.subr.bf16.mxu0 (!%p304_p10), %v1621_v1 }
  0x16   : > { %s339_s27 = scalar_select %p338_p11, %s1611_s12, 1  ;;  %1372 = vmatpush3.bf16.msra.mxu1 %v1522_v8 }
  0x17   : > { %1385 = vmatprep.subr.bf16.mxu1 %v1621_v1 }
  0x18   : > { %s1296_s28 = sshll.u32 %s339_s27, 2 }
  0x19   : > { %s341_s20 = scalar_lea.vmem %s1942_s0, %s1296_s28  ;;  %s1325_s28 = sshll.u32 %s1611_s12, 7 }
  0x1a   : > { %v347_v4 = vld [vmem:[%s341_s20] sm:$0xf]  ;;  %s1206_s12 = scalar_lea.sflag [#allocation5], %s335_s24 }
  0x1b   : > { %1366 = vmatmul.mubr.msk.bf16.vlgmr.msra.gmra.mrb[0].mxu0 %vm371_vm1, %v347_v4  ;;  %v488_v6 = vld [vmem:[%s341_s20] sm:$0xf]  ;;  %1374 = vmatmul.mubr.msk.bf16.vlgmr.msra.gmra.mrb[0].mxu1 %vm371_vm1, %v347_v4  ;;  %s1623_s20 = smov 120  }
  0x1c   : > { %1378 = vmatpush3.bf16.msra.mxu0 %v1519_v3  ;;  %1381 = vmatprep.mubr.msk.bf16.mxu0 %vm1622_vm0, %v1621_v1 }
  0x1d   : > { %1379 = vmatprep.subr.bf16.mxu0 %v1621_v1  ;;  %1387 = vmatprep.mubr.msk.bf16.mxu1 %vm1622_vm0, %v1621_v1 }
  0x20   : > { %1380 = vmatpush3.bf16.msra.mxu0 %v1520_v5 }
  0x21   : > { %1391 = vmatprep.subr.bf16.mxu0 %v1621_v1 }
  0x23   : > { %1382 = vmatmul.mubr.msk.bf16.vlgmr.msra.gmra.mrb[4].mxu0 %vm371_vm1, %v488_v6  ;;  %v666_v6 = vld [vmem:[%s1949_s7] sm:$0xf] }
  0x24   : > { %1393 = vmatprep.mubr.msk.bf16.mxu0 %vm1622_vm0, %v1621_v1 }
  0xee   : > { %v409_v10 = vpop.f32.mrb[0].mxu0  ;;  %v475_v27 = vpop.f32.mrb[0].mxu1 }
  0xef   : > { %v410_v11 = vadd.f32 %v1297_v9, %v409_v10  ;;  %v1367_v12 = vpop.f32.mrb[1].mxu0  ;;  %v476_v28 = vadd.f32 %v1301_v26, %v475_v27  ;;  %v1375_v29 = vpop.f32.mrb[1].mxu1  ;;  %v836_v9 = vsel %vm621_vm4, %v666_v6, 0 }
  0xf0   : > { %v412_v13 = vpop.f32.mrb[2].mxu0  ;;  %v478_v30 = vpop.f32.mrb[2].mxu1 }
  0xf1   : > { %v415_v14 = vpack.c.bf16 %v410_v11, %v410_v11  ;;  %v1368_v15 = vpop.f32.mrb[3].mxu0  ;;  %v481_v31 = vpack.c.bf16 %v476_v28, %v476_v28  ;;  %v1376_v32 = vpop.f32.mrb[3].mxu1 }
  0xf3   : > { %417 = vst.msk [vmem:[#allocation2] sm:$0xf] %vm416_vm2, %v415_v14  ;;  %482 = vst.msk [vmem:[#allocation3] sm:$0xf] %vm416_vm2, %v481_v31 }
  0xf6   : > { %v550_v16 = vpop.f32.mrb[4].mxu0 }
  0xf7   : > { %v1383_v17 = vpop.f32.mrb[5].mxu0  ;;  %v551_v24 = vadd.f32 %v1305_v18, %v550_v16 }
  0xf8   : > { %v553_v19 = vpop.f32.mrb[6].mxu0 }
  0xf9   : > { %v1384_v20 = vpop.f32.mrb[7].mxu0  ;;  %v1789_v25 = vpack.c.bf16 %v551_v24, %v551_v24 }
  0xfa   : > { %v557_v21 = vld [vmem:[#allocation2] sm:$0xf]  ;;  %v558_v33 = vld [vmem:[#allocation3] sm:$0xf] }
  0xfb   : > { %v564_v22 = vsel %vm559_vm3, %v557_v21, 0  ;;  %v1784_v23 = vcombine.low %v557_v21, %v557_v21  ;;  %v623_v34 = vsel %vm621_vm4, %v558_v33, 0  ;;  %v1811_v53 = vcombine.low %v558_v33, %v558_v33 }
  0xfc   : > { %1386 = vmatpush3.bf16.xpose.msra.mxu1 %v564_v22  ;;  %1392 = vmatpush3.bf16.msra.mxu0 %v623_v34 }
  0xfd   : > { %673 = vrot.lane.b32.xlu0 %v1784_v23, %s1623_s20  ;;  %1397 = vmatprep.subr.bf16.mxu1 %v1621_v1 }
  0xfe   : > { %1403 = vmatprep.subr.bf16.mxu0 %v1621_v1 }
 0x101   : > { %668 = vrot.lane.b32.xlu0 %v1789_v25, %s1623_s20 }
 0x103   : > { %1388 = vmatmul.mubr.msk.bf16.vlgmr.msra.gmra.mrb[4].mxu1 %vm559_vm3, %v1789_v25 }
 0x104   : > { %1399 = vmatprep.mubr.msk.bf16.mxu1 %vm1622_vm0, %v1621_v1 }
 0x16f   : > { %v674_v35 = vpop.permute.xlu0 %673 }
 0x170   : > { %v679_v36 = vsel %vm559_vm3, %v674_v35, 0 }
 0x171   : > { %1398 = vmatpush3.bf16.xpose.msra.mxu1 %v679_v36 }
 0x172   : > { %1409 = vmatprep.subr.bf16.mxu1 %v1621_v1 }
 0x173   : > { %v669_v37 = vpop.permute.xlu0 %668 }
 0x178   : > { %1400 = vmatmul.mubr.msk.bf16.vlgmr.msra.gmra.mrb[8].mxu1 %vm559_vm3, %v669_v37 }
 0x179   : > { %1411 = vmatprep.mubr.msk.bf16.mxu1 %vm1622_vm0, %v1621_v1  ;;  %1410 = vmatpush3.bf16.msra.mxu1 %v790_v0 }
 0x17a   : > { %1421 = vmatprep.subr.bf16.mxu1 %v1621_v1 }
 0x1d6   : > { %v600_v38 = vpop.f32.mrb[4].mxu1 }
 0x1d7   : > { %v1389_v39 = vpop.f32.mrb[5].mxu1  ;;  %v606_v40 = vsel %vm559_vm3, %v600_v38, -inf }
 0x1d8   : > { %607 = vmax.xlane.f32.xlu1 %v606_v40  ;;  %v603_v41 = vpop.f32.mrb[6].mxu1 }
 0x1d9   : > { %v1390_v42 = vpop.f32.mrb[7].mxu1 }
 0x24b   : > { %v715_v43 = vpop.f32.mrb[8].mxu1 }
 0x24c   : > { %v1401_v44 = vpop.f32.mrb[9].mxu1  ;;  %v721_v45 = vsel %vm559_vm3, %v715_v43, -inf }
 0x24d   : > { %722 = vmax.xlane.f32.xlu1 %v721_v45  ;;  %v718_v46 = vpop.f32.mrb[10].mxu1 }
 0x24e   : > { %v1402_v47 = vpop.f32.mrb[11].mxu1 }
 0x265   : > { %v608_v48 = vpop.xlane.xlu1 %607 }
 0x266   : > { %v609_v49 = vsub.f32 %v600_v38, %v608_v48 }
 0x268   : > { %v610_v50 = vmul.f32 1.442695, %v609_v49 }
 0x26a   : > { %1525 = vpow2.f32 %v610_v50 }
 0x274   : > { %v1526_v51 = vpop.eup %1525 }
 0x275   : > { %v612_v52 = vsel %vm559_vm3, %v1526_v51, 0.0 }
 0x276   : > { %613 = vadd.xlane.f32.xlu0 %v612_v52 }
 0x28c   : > { %940 = vrot.lane.b32.xlu0 %v1811_v53, %s1624_s25 }
 0x2da   : > { %v723_v54 = vpop.xlane.xlu1 %722 }
 0x2db   : > { %v724_v55 = vsub.f32 %v715_v43, %v723_v54 }
 0x2dd   : > { %v725_v56 = vmul.f32 1.442695, %v724_v55 }
 0x2df   : > { %1527 = vpow2.f32 %v725_v56 }
 0x2e9   : > { %v1528_v57 = vpop.eup %1527 }
 0x2ea   : > { %v727_v58 = vsel %vm559_vm3, %v1528_v57, 0.0 }
 0x2eb   : > { %728 = vadd.xlane.f32.xlu1 %v727_v58 }
 0x2fc   : > { %736 = vrot.lane.b32.xlu1 %v1811_v53, %s1623_s20  ;;  %s1894_s20 = scalar_lea.hbm %s1951_s9, %s1325_s28 }
 0x300   : > { %880 = vrot.lane.b32.xlu1 %v1784_v23, %s1624_s25 }
 0x303   : > { %v614_v59 = vpop.xlane.xlu0 %613 }
 0x304   : > { %1529 = vrcp.f32 %v614_v59  ;;  %878 = vrot.lane.b32.xlu1 %v1789_v25, %s1624_s25  ;;  %s1295_s25 = sshll.u32 %s335_s24, 3 }
 0x305   : > { %s337_s29 = scalar_lea.vmem [#allocation4], %s1295_s25  ;;  %s1626_s25 = smov [#allocation4]  }
 0x306   : > { %s1545_s26 = sshll.u32 %s1626_s25, 4  ;;  %s1546_s26 = int_to_ptr.vmem [resolvable:$false] %s1545_s26 }
 0x307   : > { %v941_v10 = vpop.permute.xlu0 %940  ;;  %s1547_s27 = scalar_lea.vmem %s1546_s26, 256 }
 0x308   : > { %v946_v15 = vsel %vm621_vm4, %v941_v10, 0 }
 0x30e   : > { %v1530_v60 = vpop.eup %1529 }
 0x30f   : > { %v616_v61 = vmul.f32 %v1530_v60, %v1526_v51 }
 0x311   : > { %v617_v62 = vpack.c.bf16 %v616_v61, %v616_v61 }
 0x313   : > { %1394 = vmatmul.mubr.msk.bf16.vlgmr.msra.gmra.mrb[8].mxu0 %vm559_vm3, %v617_v62 }
 0x314   : > { %1405 = vmatprep.mubr.msk.bf16.mxu0 %vm1622_vm0, %v1621_v1 }
 0x378   : > { %v729_v2 = vpop.xlane.xlu1 %728 }
 0x379   : > { %1531 = vrcp.f32 %v729_v2 }
 0x37c   : > { %v737_v3 = vpop.permute.xlu1 %736 }
 0x37d   : > { %v742_v4 = vsel %vm621_vm4, %v737_v3, 0 }
 0x37e   : > { %1404 = vmatpush3.bf16.msra.mxu0 %v742_v4 }
 0x37f   : > { %1415 = vmatprep.subr.bf16.mxu0 %v1621_v1 }
 0x380   : > { %v881_v17 = vpop.permute.xlu1 %880 }
 0x381   : > { %v886_v22 = vsel %vm559_vm3, %v881_v17, 0 }
 0x383   : > { %v1532_v5 = vpop.eup %1531 }
 0x384   : > { %v731_v7 = vmul.f32 %v1532_v5, %v1528_v57  ;;  %v879_v26 = vpop.permute.xlu1 %878 }
 0x386   : > { %v732_v8 = vpack.c.bf16 %v731_v7, %v731_v7 }
 0x388   : > { %1406 = vmatmul.mubr.msk.bf16.vlgmr.msra.gmra.mrb[12].mxu0 %vm559_vm3, %v732_v8 }
 0x389   : > { %1416 = vmatpush3.bf16.msra.mxu0 %v836_v9  ;;  %1417 = vmatprep.mubr.msk.bf16.mxu0 %vm1622_vm0, %v1621_v1 }
 0x38a   : > { %1427 = vmatprep.subr.bf16.mxu0 %v1621_v1 }
 0x3e6   : > { %v659_v11 = vpop.f32.mrb[8].mxu0 }
 0x3e7   : > { %v665_v12 = vpack.c.bf16 %v659_v11, %v659_v11  ;;  %v1395_v13 = vpop.f32.mrb[9].mxu0 }
 0x3e8   : > { %v662_v14 = vpop.f32.mrb[10].mxu0 }
 0x3e9   : > { %v1396_v16 = vpop.f32.mrb[11].mxu0  ;;  %1418 = vmatmul.mubr.msk.bf16.vlgmr.msra.gmra.mrb[16].mxu0 %vm559_vm3, %v665_v12 }
 0x3ea   : > { %1428 = vmatpush3.bf16.msra.mxu0 %v946_v15  ;;  %1429 = vmatprep.mubr.msk.bf16.mxu0 %vm1622_vm0, %v1621_v1 }
 0x3eb   : > { %1439 = vmatprep.subr.bf16.mxu0 %v1621_v1 }
 0x45b   : > { %v778_v18 = vpop.f32.mrb[12].mxu0 }
 0x45c   : > { %v784_v19 = vpack.c.bf16 %v778_v18, %v778_v18  ;;  %v1407_v20 = vpop.f32.mrb[13].mxu0 }
 0x45d   : > { %v781_v21 = vpop.f32.mrb[14].mxu0 }
 0x45e   : > { %v1408_v24 = vpop.f32.mrb[15].mxu0  ;;  %1412 = vmatmul.mubr.msk.bf16.vlgmr.msra.gmra.mrb[12].mxu1 %vm559_vm3, %v784_v19 }
 0x45f   : > { %1422 = vmatpush3.bf16.xpose.msra.mxu1 %v886_v22  ;;  %1423 = vmatprep.mubr.msk.bf16.mxu1 %vm1622_vm0, %v1621_v1  ;;  %v1323_v24 = vld [vmem:[%s1950_s8] ss:$0 sm:$0xff] }
 0x460   : > { %1433 = vmatprep.subr.bf16.mxu1 %v1621_v1 }
 0x466   : > { %1424 = vmatmul.mubr.msk.bf16.vlgmr.msra.gmra.mrb[16].mxu1 %vm559_vm3, %v879_v26 }
 0x467   : > { %1435 = vmatprep.mubr.msk.bf16.mxu1 %vm1622_vm0, %v1621_v1 }
 0x4bc   : > { %v872_v27 = vpop.f32.mrb[16].mxu0 }
 0x4bd   : > { %v1419_v28 = vpop.f32.mrb[17].mxu0 }
 0x4be   : > { %v875_v29 = vpop.f32.mrb[18].mxu0 }
 0x4bf   : > { %v1420_v30 = vpop.f32.mrb[19].mxu0 }
 0x531   : > { %v826_v31 = vpop.f32.mrb[12].mxu1 }
 0x532   : > { %v1850_v32 = vadd.f32 %v872_v27, %v826_v31  ;;  %v1413_v33 = vpop.f32.mrb[13].mxu1 }
 0x533   : > { %v829_v34 = vpop.f32.mrb[14].mxu1 }
 0x534   : > { %v1414_v35 = vpop.f32.mrb[15].mxu1 }
 0x539   : > { %v922_v36 = vpop.f32.mrb[16].mxu1 }
 0x53a   : > { %v1425_v37 = vpop.f32.mrb[17].mxu1  ;;  %v928_v38 = vsel %vm559_vm3, %v922_v36, -inf }
 0x53b   : > { %929 = vmax.xlane.f32.xlu1 %v928_v38  ;;  %v925_v39 = vpop.f32.mrb[18].mxu1 }
 0x53c   : > { %v1426_v40 = vpop.f32.mrb[19].mxu1 }
 0x5c8   : > { %v930_v41 = vpop.xlane.xlu1 %929 }
 0x5c9   : > { %v931_v42 = vsub.f32 %v922_v36, %v930_v41 }
 0x5cb   : > { %v932_v43 = vmul.f32 1.442695, %v931_v42 }
 0x5cd   : > { %1533 = vpow2.f32 %v932_v43 }
 0x5d7   : > { %v1534_v44 = vpop.eup %1533 }
 0x5d8   : > { %v934_v45 = vsel %vm559_vm3, %v1534_v44, 0.0 }
 0x5d9   : > { %935 = vadd.xlane.f32.xlu0 %v934_v45 }
 0x5ef   : > { %1039 = vrot.lane.b32.xlu0 %v1784_v23, %s1625_s15 }
 0x5f3   : > { %1037 = vrot.lane.b32.xlu0 %v1789_v25, %s1625_s15  ;;  %v989_v25 = vld [vmem:[%s1949_s7 + $0x8] sm:$0xf] }
 0x5f4   : > { %v994_v52 = vsel %vm621_vm4, %v989_v25, 0 }
 0x5f5   : > { %1434 = vmatpush3.bf16.msra.mxu1 %v994_v52 }
 0x5f6   : > { %1445 = vmatprep.subr.bf16.mxu1 %v1621_v1 }
 0x666   : > { %v936_v46 = vpop.xlane.xlu0 %935 }
 0x667   : > { %1535 = vrcp.f32 %v936_v46 }
 0x66a   : > { %v1040_v49 = vpop.permute.xlu0 %1039 }
 0x66b   : > { %v1045_v51 = vsel %vm559_vm3, %v1040_v49, 0 }
 0x66e   : > { %v1038_v23 = vpop.permute.xlu0 %1037 }
 0x671   : > { %v1536_v47 = vpop.eup %1535 }
 0x672   : > { %v938_v48 = vmul.f32 %v1536_v47, %v1534_v44 }
 0x674   : > { %v939_v50 = vpack.c.bf16 %v938_v48, %v938_v48 }
 0x676   : > { %1430 = vmatmul.mubr.msk.bf16.vlgmr.msra.gmra.mrb[20].mxu0 %vm559_vm3, %v939_v50 }
 0x677   : > { %1440 = vmatpush3.bf16.xpose.msra.mxu0 %v1045_v51  ;;  %1441 = vmatprep.mubr.msk.bf16.mxu0 %vm1622_vm0, %v1621_v1 }
 0x678   : > { %1451 = vmatprep.subr.bf16.mxu0 %v1621_v1 }
 0x67e   : > { %1442 = vmatmul.mubr.msk.bf16.vlgmr.msra.gmra.mrb[24].mxu0 %vm559_vm3, %v1038_v23 }
 0x67f   : > { %1453 = vmatprep.mubr.msk.bf16.mxu0 %vm1622_vm0, %v1621_v1 }
 0x749   : > { %v982_v54 = vpop.f32.mrb[20].mxu0 }
 0x74a   : > { %v988_v55 = vpack.c.bf16 %v982_v54, %v982_v54  ;;  %v1431_v56 = vpop.f32.mrb[21].mxu0 }
 0x74b   : > { %v985_v57 = vpop.f32.mrb[22].mxu0 }
 0x74c   : > { %v1432_v58 = vpop.f32.mrb[23].mxu0  ;;  %1436 = vmatmul.mubr.msk.bf16.vlgmr.msra.gmra.mrb[20].mxu1 %vm559_vm3, %v988_v55 }
 0x74d   : > { %1447 = vmatprep.mubr.msk.bf16.mxu1 %vm1622_vm0, %v1621_v1  ;;  %v1148_v1 = vld [vmem:[%s1949_s7 + $0xc] sm:$0xf] }
 0x74e   : > { %v1153_v6 = vsel %vm621_vm4, %v1148_v1, 0 }
 0x74f   : > { %1452 = vmatpush3.bf16.msra.mxu0 %v1153_v6 }
 0x751   : > { %v1081_v59 = vpop.f32.mrb[24].mxu0 }
 0x752   : > { %v1443_v60 = vpop.f32.mrb[25].mxu0  ;;  %v1087_v61 = vsel %vm559_vm3, %v1081_v59, -inf }
 0x753   : > { %1088 = vmax.xlane.f32.xlu0 %v1087_v61  ;;  %v1084_v62 = vpop.f32.mrb[26].mxu0 }
 0x754   : > { %v1444_v63 = vpop.f32.mrb[27].mxu0 }
 0x7e0   : > { %v1089_v0 = vpop.xlane.xlu0 %1088 }
 0x7e1   : > { %v1090_v2 = vsub.f32 %v1081_v59, %v1089_v0 }
 0x7e3   : > { %v1091_v3 = vmul.f32 1.442695, %v1090_v2 }
 0x7e5   : > { %1537 = vpow2.f32 %v1091_v3 }
 0x7ef   : > { %v1538_v4 = vpop.eup %1537 }
 0x7f0   : > { %v1093_v5 = vsel %vm559_vm3, %v1538_v4, 0.0 }
 0x7f1   : > { %1094 = vadd.xlane.f32.xlu1 %v1093_v5 }
 0x802   : > { %1099 = vrot.lane.b32.xlu1 %v1811_v53, %s1625_s15  ;;  %s1220_s15 = sshll.u32 %s337_s29, 4  ;;  %s1896_s15 = int_to_ptr.vmem [resolvable:$true] %s1220_s15 }
 0x803   : > { %s1541_s23 = scalar_lea.vmem %s1896_s15, 128  ;;  %p1548_p1 = scmp.lt.s32.totalorder %s1896_s15, %s1546_s26 }
 0x804   : > { %p1542_p12 = scmp.ne.s32.totalorder %s1896_s15, %s1541_s23  ;;  %p1549_p2 = scmp.lt.s32.totalorder %s1547_s27, %s1541_s23 }
 0x806   : > { %p1543_p13 = pnand %p1542_p12, %p1717_p4  ;;  %p1550_p3 = por %p1549_p2, %p1548_p1 }
 0x808   : > { %p1544_p0 = pneg %p1543_p13 }
 0x80a   : > { %p1551_p5 = pnand %p1550_p3, %p1544_p0 }
 0x81f   : > { %v1030_v7 = vpop.f32.mrb[20].mxu1 }
 0x820   : > { %v1036_v8 = vadd.f32 %v1030_v7, %v1850_v32  ;;  %v1437_v9 = vpop.f32.mrb[21].mxu1 }
 0x821   : > { %v1033_v10 = vpop.f32.mrb[22].mxu1 }
 0x822   : > { %v1438_v11 = vpop.f32.mrb[23].mxu1 }
 0x87e   : > { %v1095_v12 = vpop.xlane.xlu1 %1094 }
 0x87f   : > { %1539 = vrcp.f32 %v1095_v12 }
 0x882   : > { %v1100_v13 = vpop.permute.xlu1 %1099 }
 0x883   : > { %v1105_v14 = vsel %vm621_vm4, %v1100_v13, 0 }
 0x884   : > { %1446 = vmatpush3.bf16.msra.mxu1 %v1105_v14 }
 0x889   : > { %v1540_v53 = vpop.eup %1539 }
 0x88a   : > { %v1097_v15 = vmul.f32 %v1540_v53, %v1538_v4 }
 0x88c   : > { %v1098_v16 = vpack.c.bf16 %v1097_v15, %v1097_v15 }
 0x88e   : > { %1448 = vmatmul.mubr.msk.bf16.vlgmr.msra.gmra.mrb[24].mxu1 %vm559_vm3, %v1098_v16 }
 0x961   : > { %v1141_v17 = vpop.f32.mrb[24].mxu1 }
 0x962   : > { %v1147_v18 = vpack.c.bf16 %v1141_v17, %v1141_v17  ;;  %v1449_v19 = vpop.f32.mrb[25].mxu1 }
 0x963   : > { %v1144_v20 = vpop.f32.mrb[26].mxu1 }
 0x964   : > { %v1450_v21 = vpop.f32.mrb[27].mxu1  ;;  %1454 = vmatmul.mubr.msk.bf16.vlgmr.msra.gmra.mrb[28].mxu0 %vm559_vm3, %v1147_v18 }
 0xa37   : > { %v1189_v22 = vpop.f32.mrb[28].mxu0 }
 0xa38   : > { %v1195_v26 = vadd.f32 %v1189_v22, %v1036_v8  ;;  %v1455_v27 = vpop.f32.mrb[29].mxu0 }
 0xa39   : > { %v1192_v28 = vpop.f32.mrb[30].mxu0 }
 0xa3a   : > { %v1203_v29 = vadd.f32 %v1323_v24, %v1195_v26  ;;  %v1456_v30 = vpop.f32.mrb[31].mxu0 }
 0xa3c   : > { %1204 = vst.msk [vmem:[%s337_s29] sm:$0xff] %vm371_vm1, %v1203_v29 }
 0xa3d   : > { %1554 = shalt.err (!%p1551_p5)
}
 0xa3e   : > { %s1555_s24 = scalar_lea.hbm %s1894_s20, 128  ;;  %s1559_s16 = scalar_lea.hbm %s1951_s9, 256 }
 0xa3f   : > { %p1556_p6 = scmp.ne.s32.totalorder %s1894_s20, %s1555_s24  ;;  %p1560_p10 = scmp.lt.u32.totalorder %s1894_s20, %s1951_s9 }
 0xa40   : > { %p1561_p11 = scmp.lt.u32.totalorder %s1559_s16, %s1555_s24  ;;  %p1563_p13 = scmp.lt.u32.totalorder %s1555_s24, %s1894_s20 }
 0xa41   : > { %p1557_p7 = pnand %p1556_p6, %p1717_p4 }
 0xa42   : > { %p1562_p12 = por %p1561_p11, %p1560_p10 }
 0xa43   : > { %p1558_p9 = pneg %p1557_p7 }
 0xa44   : > { %p1564_p0 = por %p1563_p13, %p1562_p12 }
 0xa46   : > { %p1565_p1 = pnand %p1564_p0, %p1558_p9 }
 0xa48   : > { %1568 = shalt.err (!%p1565_p1)
}
 0xa49   : > { %1457 = dma.vmem_to_hbm [thread:$0]  (%p1717_p4), %s1896_s15, 128, %s1894_s20, %s1206_s12  }
 0xa4a PF: > { %p1463_p2 = scmp.ge.s32.totalorder %s1619_s14, 2  ;;  %s1232_s23 = sand.u32 1, %s1599_s30  }
 0xa4b   : > { %s1233_s26 = scalar_lea.sflag [#allocation5], %s1232_s23 }
 0xa4c   : > { %p1460_p3 = pnand %p1463_p2, %p1724_p8 }
 0xa4e   : > { %1594 = dma.done.wait (!%p1460_p3), %s1233_s26, 128  }
 0xa4f   : > { %1596 = vsyncadd (!%p1460_p3), %s1233_s26, 4294967168  ;;  %s22_s14 = sadd.s32 1, %s1619_s14   ;;  %s1954_s30 = smov %s1603_s10 }
 0xa50   : > { %p19_p5 = scmp.ge.s32.totalorder %s22_s14, 4   ;;  %s1955_s10 = smov %s1607_s11 }
 0xa51   : > { %s1956_s11 = smov %s1730_s22  ;;  %s1957_s12 = smov %s1615_s13 }
 0xa52   : > { %s1958_s13 = smov %s1960_s17  ;;  %21 = sbr.rel (!%p19_p5) target bundleno = 4 (0x4), region = 96 }
 0xa59   :  { %1238 = vsyncpa [#allocation5], 1 }
 0xa5a   :  { %1240 = vsyncpa [#allocation5 + $0x1], 1 }

</bundles_post_ra>
